<compile_context>
chip_gen: v6e
topology: v6e:2x2x1
jax: 0.10.0
libtpu: 0.0.40
codegen_flags: <defaults>
</compile_context>

<pallas_src>
import numpy as np
import jax
import jax.numpy as jnp
from jax import lax
from jax.experimental import pallas as pl
from jax.experimental.pallas import tpu as pltpu

PAD = 2                                   # kernel_size // 2
DX = 2.0 * np.pi / 64.0                   # self.dx in the torch module (fixed)
C1 = np.float32((1.0 / 12.0) / DX)
C8 = np.float32((8.0 / 12.0) / DX)

LAP_2D_X = [[[[0, 0, 0, 0, 0],
              [0, 0, 0, 0, 0],
              [1 / 12, -8 / 12, 0, 8 / 12, -1 / 12],
              [0, 0, 0, 0, 0],
              [0, 0, 0, 0, 0]]]]
LAP_2D_Y = [[[[0, 0, 1 / 12, 0, 0],
              [0, 0, -8 / 12, 0, 0],
              [0, 0, 0, 0, 0],
              [0, 0, 8 / 12, 0, 0],
              [0, 0, -1 / 12, 0, 0]]]]


def convective_kernel(x_ref, o_ref, pad_ref):
    """x_ref/o_ref: (Bblk, 2, H, W) f32 blocks.  pad_ref: (Bblk, 2, H+4, W+4) VMEM."""
    _, _, h, w = x_ref.shape
    x = x_ref[...]                                          # (Bblk, 2, H, W)

    # Periodic halo in VMEM (torch periodic_padding: wrap W first, then H,
    # so the corners carry the W-wrapped values).
    pad_ref[:, :, PAD:PAD + h, PAD:PAD + w] = x
    pad_ref[:, :, PAD:PAD + h, 0:PAD] = x[:, :, :, w - PAD:w]
    pad_ref[:, :, PAD:PAD + h, PAD + w:PAD + w + PAD] = x[:, :, :, 0:PAD]
    pad_ref[:, :, 0:PAD, :] = pad_ref[:, :, h:h + PAD, :]
    pad_ref[:, :, PAD + h:PAD + h + PAD, :] = pad_ref[:, :, PAD:PAD + PAD, :]

    def tap(dy, dx):
        # Shifted (H, W) window of the padded field for every (batch, channel).
        return pad_ref[:, :, dy:dy + h, dx:dx + w]

    # 4th-order central differences (cross-correlation with LAP_2D_X / LAP_2D_Y);
    # each tap covers both channels so the shifted loads are shared by u and v.
    gx = C1 * tap(PAD, 0) - C8 * tap(PAD, 1) + C8 * tap(PAD, 3) - C1 * tap(PAD, 4)
    gy = C1 * tap(0, PAD) - C8 * tap(1, PAD) + C8 * tap(3, PAD) - C1 * tap(4, PAD)

    u = x[:, 0:1]                                           # (Bblk, 1, H, W), broadcasts
    v = x[:, 1:2]
    # [convective_u, convective_v] in a single contiguous store.
    o_ref[...] = u * gx + v * gy
    # TODO(synk): on v5e a (64,64)->(32,128) lane-dense repack before this store
    # would replace masked vst with full-width stores; skipped pending measurement.


def _choose_batch_block(batch):
    # Amortise the ~0.35us/step grid overhead with multi-element blocks, while
    # keeping >= 2 grid steps whenever batch >= 2 so the v7x megacore can split
    # the batch across both TensorCores.
    if batch <= 1:
        return 1
    return max(1, min(8, batch // 2))


@jax.jit
def papm_convective_flow(x):
    """x: (B, 2, H, W) float32 -> (B, 2, H, W) convective term (NCHW)."""
    x = x.astype(jnp.float32)
    batch, ch, h, w = x.shape
    assert ch == 2, "expects (B, 2, H, W) with channels (u, v)"
    bblk = _choose_batch_block(batch)
    return pl.pallas_call(
        convective_kernel,
        out_shape=jax.ShapeDtypeStruct((batch, 2, h, w), jnp.float32),
        grid=(pl.cdiv(batch, bblk),),
        in_specs=[pl.BlockSpec((bblk, 2, h, w), lambda b: (b, 0, 0, 0))],
        out_specs=pl.BlockSpec((bblk, 2, h, w), lambda b: (b, 0, 0, 0)),
        scratch_shapes=[pltpu.VMEM((bblk, 2, h + 2 * PAD, w + 2 * PAD),
                                   jnp.float32)],
        compiler_params=pltpu.CompilerParams(
            dimension_semantics=("parallel",)),
    )(x)
    # TODO(synk): for batch==1 on v7x, a second parallel grid axis over the two
    # output channels would keep both TensorCores busy; omitted for the demo.


def reference_forward(x):
    """Literal JAX port of the PyTorch forward (lax convs, highest precision)."""
    w_x = (1.0 / DX) * jnp.asarray(LAP_2D_X, jnp.float32)   # (1,1,5,5) OIHW
    w_y = (1.0 / DX) * jnp.asarray(LAP_2D_Y, jnp.float32)
    xpad = jnp.pad(x, ((0, 0), (0, 0), (PAD, PAD), (PAD, PAD)), mode="wrap")
    u, v = xpad[:, 0:1], xpad[:, 1:2]
    dn = ("NCHW", "OIHW", "NCHW")
    conv = lambda a, w: lax.conv_general_dilated(
        a, w, (1, 1), "VALID", dimension_numbers=dn,
        precision=lax.Precision.HIGHEST)
    u_gx, u_gy = conv(u, w_x), conv(u, w_y)
    v_gx, v_gy = conv(v, w_x), conv(v, w_y)
    uc, vc = u[:, :, PAD:-PAD, PAD:-PAD], v[:, :, PAD:-PAD, PAD:-PAD]
    conv_u = uc * u_gx + vc * u_gy
    conv_v = uc * v_gx + vc * v_gy
    return jnp.concatenate([conv_u, conv_v], axis=1)


if __name__ == "__main__":
    key = jax.random.PRNGKey(0)
    B, H, W = 2, 64, 64
    x = jax.random.normal(key, (B, 2, H, W), dtype=jnp.float32)

    out = papm_convective_flow(x)
    out = jax.block_until_ready(out)
    assert out.shape == (B, 2, H, W), out.shape

    ref = reference_forward(x)
    denom = float(jnp.max(jnp.abs(ref))) + 1e-8
    rel = float(jnp.max(jnp.abs(out - ref))) / denom
    assert rel < 1e-3, f"max relative error {rel}"

    print("KERNEL_OK")
</pallas_src>

<mosaic_0001>
module attributes {stable_mosaic.version = 11 : i64} {
  func.func @convective_kernel(%arg0: i32, %arg1: memref<1x2x64x64xf32, #tpu.memory_space<vmem>>, %arg2: memref<1x2x64x64xf32, #tpu.memory_space<vmem>>, %arg3: memref<1x2x68x68xf32, #tpu.memory_space<vmem>>) attributes {dimension_semantics = [#tpu.dimension_semantics<parallel>], iteration_bounds = array<i64: 2>, scalar_prefetch = 0 : i64, scratch_operands = 1 : i64, tpu.core_type = #tpu.core_type<tc>, window_params = [{transform_indices = @transform_0, window_bounds = array<i64: 1, 2, 64, 64>}, {transform_indices = @transform_1, window_bounds = array<i64: 1, 2, 64, 64>}]} {
    %c0 = arith.constant 0 : index
    %c0_0 = arith.constant 0 : index
    %c0_1 = arith.constant 0 : index
    %c0_2 = arith.constant 0 : index
    %0 = vector.load %arg1[%c0, %c0_0, %c0_1, %c0_2] : memref<1x2x64x64xf32, #tpu.memory_space<vmem>>, vector<1x2x64x64xf32>
    %c0_3 = arith.constant 0 : index
    %c0_4 = arith.constant 0 : index
    %c2 = arith.constant 2 : index
    %c2_5 = arith.constant 2 : index
    %1 = vector.load %arg3[%c0_3, %c0_4, %c2, %c2_5] : memref<1x2x68x68xf32, #tpu.memory_space<vmem>>, vector<1x2x64x64xf32>
    tpu.vector_store %arg3[%c0_3, %c0_4, %c2, %c2_5], %0 {strides = array<i32>} : memref<1x2x68x68xf32, #tpu.memory_space<vmem>>, vector<1x2x64x64xf32>,
    %2 = vector.extract_strided_slice %0 {offsets = [0, 0, 0, 62], sizes = [1, 2, 64, 2], strides = [1, 1, 1, 1]} : vector<1x2x64x64xf32> to vector<1x2x64x2xf32>
    %c0_6 = arith.constant 0 : index
    %c0_7 = arith.constant 0 : index
    %c2_8 = arith.constant 2 : index
    %c0_9 = arith.constant 0 : index
    %3 = vector.load %arg3[%c0_6, %c0_7, %c2_8, %c0_9] : memref<1x2x68x68xf32, #tpu.memory_space<vmem>>, vector<1x2x64x2xf32>
    tpu.vector_store %arg3[%c0_6, %c0_7, %c2_8, %c0_9], %2 {strides = array<i32>} : memref<1x2x68x68xf32, #tpu.memory_space<vmem>>, vector<1x2x64x2xf32>,
    %4 = vector.extract_strided_slice %0 {offsets = [0, 0, 0, 0], sizes = [1, 2, 64, 2], strides = [1, 1, 1, 1]} : vector<1x2x64x64xf32> to vector<1x2x64x2xf32>
    %c0_10 = arith.constant 0 : index
    %c0_11 = arith.constant 0 : index
    %c2_12 = arith.constant 2 : index
    %c66 = arith.constant 66 : index
    %5 = vector.load %arg3[%c0_10, %c0_11, %c2_12, %c66] : memref<1x2x68x68xf32, #tpu.memory_space<vmem>>, vector<1x2x64x2xf32>
    tpu.vector_store %arg3[%c0_10, %c0_11, %c2_12, %c66], %4 {strides = array<i32>} : memref<1x2x68x68xf32, #tpu.memory_space<vmem>>, vector<1x2x64x2xf32>,
    %c0_13 = arith.constant 0 : index
    %c0_14 = arith.constant 0 : index
    %c64 = arith.constant 64 : index
    %c0_15 = arith.constant 0 : index
    %6 = vector.load %arg3[%c0_13, %c0_14, %c64, %c0_15] : memref<1x2x68x68xf32, #tpu.memory_space<vmem>>, vector<1x2x2x68xf32>
    %c0_16 = arith.constant 0 : index
    %c0_17 = arith.constant 0 : index
    %c0_18 = arith.constant 0 : index
    %c0_19 = arith.constant 0 : index
    %7 = vector.load %arg3[%c0_16, %c0_17, %c0_18, %c0_19] : memref<1x2x68x68xf32, #tpu.memory_space<vmem>>, vector<1x2x2x68xf32>
    tpu.vector_store %arg3[%c0_16, %c0_17, %c0_18, %c0_19], %6 {strides = array<i32>} : memref<1x2x68x68xf32, #tpu.memory_space<vmem>>, vector<1x2x2x68xf32>,
    %c0_20 = arith.constant 0 : index
    %c0_21 = arith.constant 0 : index
    %c2_22 = arith.constant 2 : index
    %c0_23 = arith.constant 0 : index
    %8 = vector.load %arg3[%c0_20, %c0_21, %c2_22, %c0_23] : memref<1x2x68x68xf32, #tpu.memory_space<vmem>>, vector<1x2x2x68xf32>
    %c0_24 = arith.constant 0 : index
    %c0_25 = arith.constant 0 : index
    %c66_26 = arith.constant 66 : index
    %c0_27 = arith.constant 0 : index
    %9 = vector.load %arg3[%c0_24, %c0_25, %c66_26, %c0_27] : memref<1x2x68x68xf32, #tpu.memory_space<vmem>>, vector<1x2x2x68xf32>
    tpu.vector_store %arg3[%c0_24, %c0_25, %c66_26, %c0_27], %8 {strides = array<i32>} : memref<1x2x68x68xf32, #tpu.memory_space<vmem>>, vector<1x2x2x68xf32>,
    %c0_28 = arith.constant 0 : index
    %c0_29 = arith.constant 0 : index
    %c2_30 = arith.constant 2 : index
    %c0_31 = arith.constant 0 : index
    %10 = vector.load %arg3[%c0_28, %c0_29, %c2_30, %c0_31] : memref<1x2x68x68xf32, #tpu.memory_space<vmem>>, vector<1x2x64x64xf32>
    %cst = arith.constant 0.848826348 : f32
    %11 = vector.broadcast %cst : f32 to vector<1x2x64x64xf32>
    %12 = arith.mulf %11, %10 : vector<1x2x64x64xf32>
    %c0_32 = arith.constant 0 : index
    %c0_33 = arith.constant 0 : index
    %c2_34 = arith.constant 2 : index
    %c1 = arith.constant 1 : index
    %13 = vector.load %arg3[%c0_32, %c0_33, %c2_34, %c1] : memref<1x2x68x68xf32, #tpu.memory_space<vmem>>, vector<1x2x64x64xf32>
    %cst_35 = arith.constant 6.79061079 : f32
    %14 = vector.broadcast %cst_35 : f32 to vector<1x2x64x64xf32>
    %15 = arith.mulf %14, %13 : vector<1x2x64x64xf32>
    %16 = arith.subf %12, %15 : vector<1x2x64x64xf32>
    %c0_36 = arith.constant 0 : index
    %c0_37 = arith.constant 0 : index
    %c2_38 = arith.constant 2 : index
    %c3 = arith.constant 3 : index
    %17 = vector.load %arg3[%c0_36, %c0_37, %c2_38, %c3] : memref<1x2x68x68xf32, #tpu.memory_space<vmem>>, vector<1x2x64x64xf32>
    %cst_39 = arith.constant 6.79061079 : f32
    %18 = vector.broadcast %cst_39 : f32 to vector<1x2x64x64xf32>
    %19 = arith.mulf %18, %17 : vector<1x2x64x64xf32>
    %20 = arith.addf %16, %19 : vector<1x2x64x64xf32>
    %c0_40 = arith.constant 0 : index
    %c0_41 = arith.constant 0 : index
    %c2_42 = arith.constant 2 : index
    %c4 = arith.constant 4 : index
    %21 = vector.load %arg3[%c0_40, %c0_41, %c2_42, %c4] : memref<1x2x68x68xf32, #tpu.memory_space<vmem>>, vector<1x2x64x64xf32>
    %cst_43 = arith.constant 0.848826348 : f32
    %22 = vector.broadcast %cst_43 : f32 to vector<1x2x64x64xf32>
    %23 = arith.mulf %22, %21 : vector<1x2x64x64xf32>
    %24 = arith.subf %20, %23 : vector<1x2x64x64xf32>
    %c0_44 = arith.constant 0 : index
    %c0_45 = arith.constant 0 : index
    %c0_46 = arith.constant 0 : index
    %c2_47 = arith.constant 2 : index
    %25 = vector.load %arg3[%c0_44, %c0_45, %c0_46, %c2_47] : memref<1x2x68x68xf32, #tpu.memory_space<vmem>>, vector<1x2x64x64xf32>
    %cst_48 = arith.constant 0.848826348 : f32
    %26 = vector.broadcast %cst_48 : f32 to vector<1x2x64x64xf32>
    %27 = arith.mulf %26, %25 : vector<1x2x64x64xf32>
    %c0_49 = arith.constant 0 : index
    %c0_50 = arith.constant 0 : index
    %c1_51 = arith.constant 1 : index
    %c2_52 = arith.constant 2 : index
    %28 = vector.load %arg3[%c0_49, %c0_50, %c1_51, %c2_52] : memref<1x2x68x68xf32, #tpu.memory_space<vmem>>, vector<1x2x64x64xf32>
    %cst_53 = arith.constant 6.79061079 : f32
    %29 = vector.broadcast %cst_53 : f32 to vector<1x2x64x64xf32>
    %30 = arith.mulf %29, %28 : vector<1x2x64x64xf32>
    %31 = arith.subf %27, %30 : vector<1x2x64x64xf32>
    %c0_54 = arith.constant 0 : index
    %c0_55 = arith.constant 0 : index
    %c3_56 = arith.constant 3 : index
    %c2_57 = arith.constant 2 : index
    %32 = vector.load %arg3[%c0_54, %c0_55, %c3_56, %c2_57] : memref<1x2x68x68xf32, #tpu.memory_space<vmem>>, vector<1x2x64x64xf32>
    %cst_58 = arith.constant 6.79061079 : f32
    %33 = vector.broadcast %cst_58 : f32 to vector<1x2x64x64xf32>
    %34 = arith.mulf %33, %32 : vector<1x2x64x64xf32>
    %35 = arith.addf %31, %34 : vector<1x2x64x64xf32>
    %c0_59 = arith.constant 0 : index
    %c0_60 = arith.constant 0 : index
    %c4_61 = arith.constant 4 : index
    %c2_62 = arith.constant 2 : index
    %36 = vector.load %arg3[%c0_59, %c0_60, %c4_61, %c2_62] : memref<1x2x68x68xf32, #tpu.memory_space<vmem>>, vector<1x2x64x64xf32>
    %cst_63 = arith.constant 0.848826348 : f32
    %37 = vector.broadcast %cst_63 : f32 to vector<1x2x64x64xf32>
    %38 = arith.mulf %37, %36 : vector<1x2x64x64xf32>
    %39 = arith.subf %35, %38 : vector<1x2x64x64xf32>
    %40 = vector.extract_strided_slice %0 {offsets = [0, 0, 0, 0], sizes = [1, 1, 64, 64], strides = [1, 1, 1, 1]} : vector<1x2x64x64xf32> to vector<1x1x64x64xf32>
    %41 = vector.extract_strided_slice %0 {offsets = [0, 1, 0, 0], sizes = [1, 1, 64, 64], strides = [1, 1, 1, 1]} : vector<1x2x64x64xf32> to vector<1x1x64x64xf32>
    %42 = vector.broadcast %40 : vector<1x1x64x64xf32> to vector<1x2x64x64xf32>
    %43 = arith.mulf %42, %24 : vector<1x2x64x64xf32>
    %44 = vector.broadcast %41 : vector<1x1x64x64xf32> to vector<1x2x64x64xf32>
    %45 = arith.mulf %44, %39 : vector<1x2x64x64xf32>
    %46 = arith.addf %43, %45 : vector<1x2x64x64xf32>
    %c0_64 = arith.constant 0 : index
    %c0_65 = arith.constant 0 : index
    %c0_66 = arith.constant 0 : index
    %c0_67 = arith.constant 0 : index
    %47 = vector.load %arg2[%c0_64, %c0_65, %c0_66, %c0_67] : memref<1x2x64x64xf32, #tpu.memory_space<vmem>>, vector<1x2x64x64xf32>
    tpu.vector_store %arg2[%c0_64, %c0_65, %c0_66, %c0_67], %46 {strides = array<i32>} : memref<1x2x64x64xf32, #tpu.memory_space<vmem>>, vector<1x2x64x64xf32>,
    return
  }
  func.func @transform_0(%arg0: i32) -> (i32, i32, i32, i32) {
    %c0_i32 = arith.constant 0 : i32
    %c0_i32_0 = arith.constant 0 : i32
    %c0_i32_1 = arith.constant 0 : i32
    %c0_i32_2 = arith.constant 0 : i32
    return %arg0, %c0_i32, %c0_i32_0, %c0_i32_1 : i32, i32, i32, i32
  }
  func.func @transform_1(%arg0: i32) -> (i32, i32, i32, i32) {
    %c0_i32 = arith.constant 0 : i32
    %c0_i32_0 = arith.constant 0 : i32
    %c0_i32_1 = arith.constant 0 : i32
    %c0_i32_2 = arith.constant 0 : i32
    return %arg0, %c0_i32, %c0_i32_0, %c0_i32_1 : i32, i32, i32, i32
  }
}

</mosaic_0001>

<bundles_post_ra>
// kernel: papm_convective_flow.1
= control target key start
LH: loop header
LB: loop body
LE: loop exit
PB: predicated region body
PF: predicated region fallthrough
CT: control target
= control target key end

     0   :  { %6 = vsyncpa [#allocation4], 0  ;;  %s1881_s0 = inlined_call_operand.hbm [shape: f32[2,2,64,64], index: 0, kind: input, shape index: {}]   ;;  %s1882_s1 = inlined_call_operand.hbm [shape: f32[2,2,64,64], index: 1, kind: output, shape index: {}]  }
   0x1   :  { %8 = vsyncpa [#allocation4 + $0x1], 0 }
   0x2   :  { %9 = vsyncpa [#allocation5], 0 }
   0x3   :  { %11 = vsyncpa [#allocation5 + $0x1], 0  ;;  %s1191_s6 = smov 0   ;;  %s1193_s7 = smov 0  }
   0x4   :  { %s1195_s8 = smov 0   ;;  %s1197_s9 = smov 0  }
   0x5 LB: > { %s1212_s10 = sadd.s32 4294967295, %s1167_s9   ;;  %s987_s11 = sadd.s32 4294967294, %s1167_s9   ;;  %s1167_s9 = sphi %s1197_s9, %s1949_s9   ;;  %s1163_s8 = sphi %s1195_s8, %s1948_s8   ;;  %s1159_s7 = sphi %s1193_s7, %s1947_s7   ;;  %s1155_s6 = sphi %s1191_s6, %s1946_s6  }
   0x6   : > { %s1216_s12 = sadd.s32 1, %s1167_s9   ;;  %s24_s13 = sadd.s32 1, %s1163_s8 }
   0x7   : > { %s21_s14 = ssub.s32 %s1167_s9, %s1216_s12  ;;  %p31_p0 = scmp.ne.s32.totalorder %s1163_s8, %s1159_s7 }
   0x8   : > { %p22_p1 = scmp.eq.s32.totalorder %s21_s14, 0  ;;  %p32_p2 = scmp.eq.s32.totalorder %s1167_s9, 0 }
   0x9   : > { %p37_p3 = scmp.ne.s32.totalorder %s1159_s7, %s1155_s6  ;;  %p38_p4 = scmp.eq.s32.totalorder %s1212_s10, 0 }
   0xa   : > { %s1228_s15 = scalar_select %p22_p1, %s1163_s8, %s24_s13  }
   0xb   : > { %p1230_p5 = por %p32_p2, %p31_p0  ;;  %p1234_p6 = por %p38_p4, %p37_p3 }
   0xc   : > { %p61_p7 = scmp.eq.s32.totalorder %s1212_s10, 1  ;;  %p67_p8 = scmp.eq.s32.totalorder %s987_s11, 1 }
   0xd   : > { %s1894_s17 = scalar_select %p1234_p6, 1, 0 }
   0xe   : > { %p1015_p10 = scmp.lt.s32.totalorder %s1167_s9, 2  ;;  %p1241_p11 = por %p61_p7, %p31_p0 }
   0xf   : > { %p1245_p12 = por %p67_p8, %p37_p3  ;;  %s87_s20 = sand.u32 1, %s1163_s8  }
  0x10   : > { %s1895_s18 = scalar_select %p1241_p11, 1, 0 }
  0x11   : > { %s1896_s19 = scalar_select %p1245_p12, 1, 0 }
  0x12   : > { %s1001_s21 = sshll.u32 %s1167_s9, 11  ;;  %s990_s22 = sshll.u32 %s87_s20, 7 }
  0x13   : > { %s1254_s25 = scalar_lea.hbm %s1881_s0, %s1001_s21  ;;  %s91_s26 = scalar_lea.vmem [#allocation3], %s990_s22 }
  0x14   : > { %s98_s27 = sshll.u32 %s91_s26, 4  ;;  %p1258_p13 = pnand %p1015_p10, %p1230_p5  ;;  %s1262_s27 = int_to_ptr.vmem [resolvable:$true] %s98_s27 }
  0x15   : > { %s1264_s29 = scalar_lea.sflag [#allocation4], %s87_s20  ;;  %s1075_s30 = scalar_lea.hbm %s1254_s25, 2048 }
  0x16   : > { %p1076_p0 = scmp.ne.s32.totalorder %s1254_s25, %s1075_s30  ;;  %p1077_p1 = pneg %p1258_p13 }
  0x17   : > { %s1080_s4 = scalar_lea.hbm %s1881_s0, 4096  ;;  %p1081_p4 = scmp.lt.s32.totalorder %s1254_s25, %s1881_s0 }
  0x18   : > { %p1078_p2 = pnand %p1077_p1, %p1076_p0  ;;  %p1082_p5 = scmp.lt.s32.totalorder %s1080_s4, %s1075_s30 }
  0x1a   : > { %p1079_p3 = pneg %p1078_p2  ;;  %p1083_p7 = por %p1082_p5, %p1081_p4 }
  0x1c   : > { %p1084_p8 = pnand %p1083_p7, %p1079_p3 }
  0x1e   : > { %1087 = shalt.err (!%p1084_p8)
}
  0x1f   : > { %s1088_s13 = scalar_lea.vmem %s1262_s27, 2048  ;;  %s1169_s14 = smov [#allocation3]  }
  0x20   : > { %p1089_p10 = scmp.ne.s32.totalorder %s1262_s27, %s1088_s13  ;;  %s1093_s16 = sshll.u32 %s1169_s14, 4  ;;  %s1094_s16 = int_to_ptr.vmem [resolvable:$false] %s1093_s16 }
  0x21   : > { %s1095_s20 = scalar_lea.vmem %s1094_s16, 4096  ;;  %p1096_p2 = scmp.lt.s32.totalorder %s1262_s27, %s1094_s16 }
  0x22   : > { %p1091_p9 = pnand %p1089_p10, %p1077_p1  ;;  %p1097_p12 = scmp.lt.s32.totalorder %s1095_s20, %s1088_s13 }
  0x24   : > { %p1092_p0 = pneg %p1091_p9  ;;  %p1098_p11 = por %p1097_p12, %p1096_p2 }
  0x26   : > { %p1099_p6 = pnand %p1098_p11, %p1092_p0 }
  0x28   : > { %1102 = shalt.err (!%p1099_p6)
}
  0x29   : > { %s1170_s21 = smov 128   ;;  %s1171_s22 = smov 8  }
  0x2a   : > { %1010 = dma.hbm_to_vmem [thread:$0]  (!%p1258_p13), %s1254_s25, 2048, %s1262_s27, %s1264_s29, %s1170_s21, %s1170_s21, %s1171_s22  }
  0x2b   : > { %p993_p9 = scmp.ge.s32.totalorder %s1167_s9, 1  ;;  %p106_p1 = scmp.lt.s32.totalorder %s1167_s9, 3 }
  0x2d   : > { %p107_p3 = pnand %p993_p9, %p106_p1 }
  0x2f   : > { %110 = sbr.rel (%p107_p3) target bundleno = 477 (0x1dd), region = 24 }
  0x34   : > { %s1288_s23 = sand.u32 1, %s1159_s7   ;;  %p1898_p6 = scmp.ne.s32.totalorder %s1894_s17, 0 }
  0x35   : > { %s994_s24 = sshll.u32 %s1288_s23, 7  ;;  %s113_s26 = scalar_lea.sflag [#allocation4], %s1288_s23 }
  0x36   : > { %s1294_s30 = scalar_lea.vmem [#allocation3], %s994_s24 }
  0x37   : > { %1146 = dma.done.wait (%p1898_p6), %s113_s26, 2048  }
  0x38   : > { %1148 = vsyncadd (%p1898_p6), %s113_s26, 4294965248  ;;  %v137_v0 = vld [vmem:[%s1294_s30 + $0x10] sm:$0xff]  ;;  %v1302_v1 = vld [vmem:[%s1294_s30] sm:$0xff]  ;;  %s1172_s25 = smov 2   ;;  %s1173_s17 = smov 66   ;;  %vm215_vm0 = vcmask 539664  }
  0x39   : > { %171 = vrot.lane.b32.xlu1 %v137_v0, %s1172_s25  ;;  %167 = vrot.lane.b32.xlu0 %v1302_v1, %s1172_s25  ;;  %v138_v2 = vld [vmem:[%s1294_s30 + $0x18] sm:$0xff]  ;;  %v1307_v3 = vld [vmem:[%s1294_s30 + $0x8] sm:$0xff]  ;;  %vm280_vm1 = vcmask 15360   ;;  %vm297_vm2 = vcmask 556560   ;;  %vm316_vm3 = vcmask 549888   ;;  %s1174_s27 = smov 127  }
  0x3a   : > { %v140_v4 = vld [vmem:[%s1294_s30 + $0x28] sm:$0xff]  ;;  %v139_v5 = vld [vmem:[%s1294_s30 + $0x20] sm:$0xff]  ;;  %v142_v6 = vld [vmem:[%s1294_s30 + $0x38] sm:$0xff]  ;;  %s1175_s28 = smov 125   ;;  %s1176_s29 = smov 124   ;;  %vm883_vm4 = vcmask 523264  }
  0x3b   : > { %v141_v7 = vld [vmem:[%s1294_s30 + $0x30] sm:$0xff]  ;;  %v1315_v8 = vld [vmem:[%s1294_s30 + $0x48] sm:$0xff]  ;;  %v1318_v9 = vld [vmem:[%s1294_s30 + $0x40] sm:$0xff]  ;;  %s1177_s2 = smov 126   ;;  %s1695_s3 = scalar_lea.vmem [#allocation6], %s994_s24 }
  0x3c   : > { %v146_v10 = vld [vmem:[%s1294_s30 + $0x58] sm:$0xff]  ;;  %v1324_v11 = vld [vmem:[%s1294_s30 + $0x50] sm:$0xff]  ;;  %v148_v12 = vld [vmem:[%s1294_s30 + $0x68] sm:$0xff]  ;;  %s1002_s4 = sshll.u32 %s1212_s10, 11  ;;  %s914_s5 = sshll.u32 %s1695_s3, 4  ;;  %s1836_s5 = int_to_ptr.vmem [resolvable:$true] %s914_s5 }
  0x3d   : > { %173 = vrot.lane.b32.xlu1 %v138_v2, %s1172_s25  ;;  %169 = vrot.lane.b32.xlu0 %v1307_v3, %s1172_s25  ;;  %v1329_v13 = vld [vmem:[%s1294_s30 + $0x60] sm:$0xff]  ;;  %v150_v14 = vld [vmem:[%s1294_s30 + $0x78] sm:$0xff]  ;;  %s1834_s14 = scalar_lea.hbm %s1882_s1, %s1002_s4  ;;  %s901_s10 = scalar_lea.sflag [#allocation5], %s1288_s23 }
  0x3e   : > { %v149_v15 = vld [vmem:[%s1294_s30 + $0x70] sm:$0xff]  ;;  %s1103_s16 = scalar_lea.vmem %s1836_s5, 2048  ;;  %p1943_p12 = scmp.ne.s32.totalorder %s1895_s18, 0 }
  0x3f   : > { %p1104_p11 = scmp.ne.s32.totalorder %s1836_s5, %s1103_s16  ;;  %s1178_s20 = smov [#allocation6]  }
  0x40   : > { %s1107_s21 = sshll.u32 %s1178_s20, 4  ;;  %s1108_s21 = int_to_ptr.vmem [resolvable:$false] %s1107_s21 }
  0x41   : > { %177 = vrot.lane.b32.xlu1 %v140_v4, %s1172_s25  ;;  %175 = vrot.lane.b32.xlu0 %v139_v5, %s1172_s25  ;;  %p1105_p13 = pnand %p1104_p11, %p1943_p12  ;;  %s1109_s22 = scalar_lea.vmem %s1108_s21, 4096 }
  0x42   : > { %p1110_p5 = scmp.lt.s32.totalorder %s1836_s5, %s1108_s21  ;;  %p1111_p7 = scmp.lt.s32.totalorder %s1109_s22, %s1103_s16 }
  0x43   : > { %p1106_p4 = pneg %p1105_p13 }
  0x44   : > { %p1112_p8 = por %p1111_p7, %p1110_p5 }
  0x45   : > { %181 = vrot.lane.b32.xlu1 %v142_v6, %s1172_s25  ;;  %179 = vrot.lane.b32.xlu0 %v141_v7, %s1172_s25 }
  0x46   : > { %p1113_p10 = pnand %p1112_p8, %p1106_p4 }
  0x49   : > { %185 = vrot.lane.b32.xlu1 %v1315_v8, %s1172_s25  ;;  %183 = vrot.lane.b32.xlu0 %v1318_v9, %s1172_s25 }
  0x4d   : > { %189 = vrot.lane.b32.xlu1 %v146_v10, %s1172_s25  ;;  %187 = vrot.lane.b32.xlu0 %v1324_v11, %s1172_s25 }
  0x51   : > { %193 = vrot.lane.b32.xlu1 %v148_v12, %s1172_s25  ;;  %191 = vrot.lane.b32.xlu0 %v1329_v13, %s1172_s25 }
  0x55   : > { %197 = vrot.lane.b32.xlu1 %v150_v14, %s1172_s25  ;;  %195 = vrot.lane.b32.xlu0 %v149_v15, %s1172_s25 }
  0x59   : > { %234 = vrot.lane.b32.xlu1 %v1307_v3, %s1173_s17  ;;  %232 = vrot.lane.b32.xlu0 %v1302_v1, %s1173_s17 }
  0x5d   : > { %238 = vrot.lane.b32.xlu1 %v138_v2, %s1173_s17  ;;  %236 = vrot.lane.b32.xlu0 %v137_v0, %s1173_s17 }
  0x61   : > { %242 = vrot.lane.b32.xlu1 %v140_v4, %s1173_s17  ;;  %240 = vrot.lane.b32.xlu0 %v139_v5, %s1173_s17 }
  0x65   : > { %246 = vrot.lane.b32.xlu1 %v142_v6, %s1173_s17  ;;  %244 = vrot.lane.b32.xlu0 %v141_v7, %s1173_s17 }
  0x69   : > { %248 = vrot.lane.b32.xlu1 %v1318_v9, %s1173_s17  ;;  %262 = vrot.lane.b32.xlu0 %v150_v14, %s1173_s17 }
  0x6d   : > { %252 = vrot.lane.b32.xlu1 %v1324_v11, %s1173_s17  ;;  %250 = vrot.lane.b32.xlu0 %v1315_v8, %s1173_s17 }
  0x71   : > { %256 = vrot.lane.b32.xlu1 %v1329_v13, %s1173_s17  ;;  %254 = vrot.lane.b32.xlu0 %v146_v10, %s1173_s17 }
  0x75   : > { %260 = vrot.lane.b32.xlu1 %v149_v15, %s1173_s17  ;;  %258 = vrot.lane.b32.xlu0 %v148_v12, %s1173_s17 }
  0xab   : > { %v172_v16 = vpop.permute.xlu1 %171  ;;  %v168_v17 = vpop.permute.xlu0 %167 }
  0xac   : > { %218 = vst.msk [vmem:[#allocation2 + $0x12] sm:$0xff] %vm215_vm0, %v172_v16  ;;  %216 = vst.msk [vmem:[#allocation2 + $0x2] sm:$0xff] %vm215_vm0, %v168_v17 }
  0xaf   : > { %v174_v18 = vpop.permute.xlu1 %173  ;;  %v170_v19 = vpop.permute.xlu0 %169 }
  0xb0   : > { %219 = vst.msk [vmem:[#allocation2 + $0x1a] sm:$0xff] %vm215_vm0, %v174_v18  ;;  %217 = vst.msk [vmem:[#allocation2 + $0xa] sm:$0xff] %vm215_vm0, %v170_v19 }
  0xb3   : > { %v178_v20 = vpop.permute.xlu1 %177  ;;  %v176_v21 = vpop.permute.xlu0 %175 }
  0xb4   : > { %221 = vst.msk [vmem:[#allocation2 + $0x2a] sm:$0xff] %vm215_vm0, %v178_v20  ;;  %220 = vst.msk [vmem:[#allocation2 + $0x22] sm:$0xff] %vm215_vm0, %v176_v21 }
  0xb7   : > { %v182_v22 = vpop.permute.xlu1 %181  ;;  %v180_v23 = vpop.permute.xlu0 %179 }
  0xb8   : > { %223 = vst.msk [vmem:[#allocation2 + $0x3a] sm:$0xff] %vm215_vm0, %v182_v22  ;;  %222 = vst.msk [vmem:[#allocation2 + $0x32] sm:$0xff] %vm215_vm0, %v180_v23 }
  0xbb   : > { %v186_v24 = vpop.permute.xlu1 %185  ;;  %v184_v25 = vpop.permute.xlu0 %183 }
  0xbc   : > { %225 = vst.msk [vmem:[#allocation2 + $0x52] sm:$0xff] %vm215_vm0, %v186_v24  ;;  %224 = vst.msk [vmem:[#allocation2 + $0x4a] sm:$0xff] %vm215_vm0, %v184_v25 }
  0xbf   : > { %v190_v26 = vpop.permute.xlu1 %189  ;;  %v188_v27 = vpop.permute.xlu0 %187 }
  0xc0   : > { %227 = vst.msk [vmem:[#allocation2 + $0x62] sm:$0xff] %vm215_vm0, %v190_v26  ;;  %226 = vst.msk [vmem:[#allocation2 + $0x5a] sm:$0xff] %vm215_vm0, %v188_v27 }
  0xc3   : > { %v194_v28 = vpop.permute.xlu1 %193  ;;  %v192_v29 = vpop.permute.xlu0 %191 }
  0xc4   : > { %229 = vst.msk [vmem:[#allocation2 + $0x72] sm:$0xff] %vm215_vm0, %v194_v28  ;;  %228 = vst.msk [vmem:[#allocation2 + $0x6a] sm:$0xff] %vm215_vm0, %v192_v29 }
  0xc7   : > { %v198_v30 = vpop.permute.xlu1 %197  ;;  %v196_v31 = vpop.permute.xlu0 %195 }
  0xc8   : > { %231 = vst.msk [vmem:[#allocation2 + $0x82] sm:$0xff] %vm215_vm0, %v198_v30  ;;  %230 = vst.msk [vmem:[#allocation2 + $0x7a] sm:$0xff] %vm215_vm0, %v196_v31 }
  0xcb   : > { %v235_v32 = vpop.permute.xlu1 %234  ;;  %v233_v33 = vpop.permute.xlu0 %232 }
  0xcc   : > { %282 = vst.msk [vmem:[#allocation2 + $0xa] sm:$0xff] %vm280_vm1, %v235_v32  ;;  %281 = vst.msk [vmem:[#allocation2 + $0x2] sm:$0xff] %vm280_vm1, %v233_v33 }
  0xcd   : > { %299 = vst.msk [vmem:[#allocation2 + $0xa] sm:$0xff] %vm297_vm2, %v235_v32  ;;  %298 = vst.msk [vmem:[#allocation2 + $0x2] sm:$0xff] %vm297_vm2, %v233_v33 }
  0xcf   : > { %v239_v34 = vpop.permute.xlu1 %238  ;;  %v237_v35 = vpop.permute.xlu0 %236 }
  0xd0   : > { %284 = vst.msk [vmem:[#allocation2 + $0x1a] sm:$0xff] %vm280_vm1, %v239_v34  ;;  %283 = vst.msk [vmem:[#allocation2 + $0x12] sm:$0xff] %vm280_vm1, %v237_v35 }
  0xd1   : > { %301 = vst.msk [vmem:[#allocation2 + $0x1a] sm:$0xff] %vm297_vm2, %v239_v34  ;;  %300 = vst.msk [vmem:[#allocation2 + $0x12] sm:$0xff] %vm297_vm2, %v237_v35 }
  0xd3   : > { %v243_v36 = vpop.permute.xlu1 %242  ;;  %v241_v37 = vpop.permute.xlu0 %240 }
  0xd4   : > { %v319_v38 = vld [vmem:[#allocation2 + $0x2] sm:$0x3]  ;;  %286 = vst.msk [vmem:[#allocation2 + $0x2a] sm:$0xff] %vm280_vm1, %v243_v36  ;;  %285 = vst.msk [vmem:[#allocation2 + $0x22] sm:$0xff] %vm280_vm1, %v241_v37  ;;  %v1366_v39 = vld [vmem:[#allocation2 + $0xa] sm:$0xff] }
  0xd5   : > { %v1368_v40 = vld [vmem:[#allocation2 + $0x2] sm:$0xff]  ;;  %321 = vst.msk [vmem:[#allocation2 + $0x42] sm:$0x3] %vm316_vm3, %v319_v38  ;;  %v1374_v41 = vmul.f32 6.790611, %v1366_v39 }
  0xd6   : > { %303 = vst.msk [vmem:[#allocation2 + $0x2a] sm:$0xff] %vm297_vm2, %v243_v36  ;;  %302 = vst.msk [vmem:[#allocation2 + $0x22] sm:$0xff] %vm297_vm2, %v241_v37  ;;  %v1377_v42 = vmul.f32 6.790611, %v1368_v40  ;;  %v1474_v26 = vmul.f32 0.84882635, %v1368_v40 }
  0xd7   : > { %v247_v43 = vpop.permute.xlu1 %246  ;;  %389 = vrot.lane.b32.xlu1 %v1374_v41, %s1174_s27  ;;  %v245_v44 = vpop.permute.xlu0 %244  ;;  %v1482_v28 = vmul.f32 0.84882635, %v1366_v39  ;;  %v675_v37 = vld [vmem:[#allocation2 + $0x3] sm:$0xff] }
  0xd8   : > { %387 = vrot.lane.b32.xlu0 %v1377_v42, %s1174_s27  ;;  %288 = vst.msk [vmem:[#allocation2 + $0x3a] sm:$0xff] %vm280_vm1, %v247_v43  ;;  %287 = vst.msk [vmem:[#allocation2 + $0x32] sm:$0xff] %vm280_vm1, %v245_v44  ;;  %v1385_v45 = vld [vmem:[#allocation2 + $0x1a] sm:$0xff]  ;;  %v1387_v46 = vld [vmem:[#allocation2 + $0x12] sm:$0xff] }
  0xd9   : > { %305 = vst.msk [vmem:[#allocation2 + $0x3a] sm:$0xff] %vm297_vm2, %v247_v43  ;;  %304 = vst.msk [vmem:[#allocation2 + $0x32] sm:$0xff] %vm297_vm2, %v245_v44  ;;  %v1392_v47 = vmul.f32 6.790611, %v1385_v45  ;;  %v1395_v48 = vmul.f32 6.790611, %v1387_v46 }
  0xda   : > { %v1479_v27 = vmul.f32 0.84882635, %v1387_v46  ;;  %v1492_v30 = vmul.f32 0.84882635, %v1385_v45  ;;  %v723_v39 = vld [vmem:[#allocation2 + $0x4] sm:$0xff]  ;;  %v597_v40 = vld [vmem:[#allocation2 + $0x10] sm:$0xff] }
  0xdb   : > { %v249_v49 = vpop.permute.xlu1 %248  ;;  %393 = vrot.lane.b32.xlu1 %v1392_v47, %s1174_s27  ;;  %v263_v50 = vpop.permute.xlu0 %262  ;;  %v596_v45 = vld [vmem:[#allocation2 + $0x8] sm:$0xff]  ;;  %v691_v46 = vmul.f32 6.790611, %v675_v37 }
  0xdc   : > { %391 = vrot.lane.b32.xlu0 %v1395_v48, %s1174_s27  ;;  %289 = vst.msk [vmem:[#allocation2 + $0x4a] sm:$0xff] %vm280_vm1, %v249_v49  ;;  %296 = vst.msk [vmem:[#allocation2 + $0x82] sm:$0xff] %vm280_vm1, %v263_v50 }
  0xdd   : > { %v1403_v51 = vld [vmem:[#allocation2 + $0x2a] sm:$0xff]  ;;  %v1405_v52 = vld [vmem:[#allocation2 + $0x22] sm:$0xff]  ;;  %306 = vst.msk [vmem:[#allocation2 + $0x4a] sm:$0xff] %vm297_vm2, %v249_v49  ;;  %313 = vst.msk [vmem:[#allocation2 + $0x82] sm:$0xff] %vm297_vm2, %v263_v50  ;;  %v613_v50 = vmul.f32 0.84882635, %v597_v40 }
  0xde   : > { %v1410_v53 = vmul.f32 6.790611, %v1403_v51  ;;  %v359_v54 = vmul.f32 6.790611, %v1405_v52  ;;  %v1489_v29 = vmul.f32 0.84882635, %v1405_v52 }
  0xdf   : > { %v253_v55 = vpop.permute.xlu1 %252  ;;  %v251_v56 = vpop.permute.xlu0 %250  ;;  %v1502_v32 = vmul.f32 0.84882635, %v1403_v51  ;;  %v725_v49 = vld [vmem:[#allocation2 + $0x14] sm:$0xff]  ;;  %v628_v52 = vld [vmem:[#allocation2 + $0x9] sm:$0xff] }
  0xe0   : > { %397 = vrot.lane.b32.xlu1 %v1410_v53, %s1174_s27  ;;  %395 = vrot.lane.b32.xlu0 %v359_v54, %s1174_s27  ;;  %v314_v57 = vld [vmem:[#allocation2 + $0x40] sm:$0x3]  ;;  %291 = vst.msk [vmem:[#allocation2 + $0x5a] sm:$0xff] %vm280_vm1, %v253_v55  ;;  %290 = vst.msk [vmem:[#allocation2 + $0x52] sm:$0xff] %vm280_vm1, %v251_v56  ;;  %v1420_v59 = vld [vmem:[#allocation2 + $0x32] sm:$0xff] }
  0xe1   : > { %v1418_v58 = vld [vmem:[#allocation2 + $0x3a] sm:$0xff]  ;;  %317 = vst.msk [vmem:[#allocation2] sm:$0x3] %vm316_vm3, %v314_v57  ;;  %v361_v61 = vmul.f32 6.790611, %v1420_v59 }
  0xe2   : > { %308 = vst.msk [vmem:[#allocation2 + $0x5a] sm:$0xff] %vm297_vm2, %v253_v55  ;;  %307 = vst.msk [vmem:[#allocation2 + $0x52] sm:$0xff] %vm297_vm2, %v251_v56  ;;  %v362_v60 = vmul.f32 6.790611, %v1418_v58  ;;  %v1499_v31 = vmul.f32 0.84882635, %v1420_v59 }
  0xe3   : > { %v257_v62 = vpop.permute.xlu1 %256  ;;  %v255_v63 = vpop.permute.xlu0 %254  ;;  %v1512_v34 = vmul.f32 0.84882635, %v1418_v58  ;;  %v599_v57 = vld [vmem:[#allocation2 + $0x20] sm:$0xff] }
  0xe4   : > { %401 = vrot.lane.b32.xlu1 %v362_v60, %s1174_s27  ;;  %399 = vrot.lane.b32.xlu0 %v361_v61, %s1174_s27  ;;  %v320_v0 = vld [vmem:[#allocation2 + $0x4a] sm:$0x3]  ;;  %v315_v2 = vld [vmem:[#allocation2 + $0x88] sm:$0x3]  ;;  %293 = vst.msk [vmem:[#allocation2 + $0x6a] sm:$0xff] %vm280_vm1, %v257_v62  ;;  %292 = vst.msk [vmem:[#allocation2 + $0x62] sm:$0xff] %vm280_vm1, %v255_v63 }
  0xe5   : > { %v1431_v4 = vld [vmem:[#allocation2 + $0x4a] sm:$0xff]  ;;  %322 = vst.msk [vmem:[#allocation2 + $0x8a] sm:$0x3] %vm316_vm3, %v320_v0  ;;  %318 = vst.msk [vmem:[#allocation2 + $0x48] sm:$0x3] %vm316_vm3, %v315_v2  ;;  %v1462_v24 = vld [vmem:[#allocation2 + $0x82] sm:$0xff] }
  0xe6   : > { %310 = vst.msk [vmem:[#allocation2 + $0x6a] sm:$0xff] %vm297_vm2, %v257_v62  ;;  %309 = vst.msk [vmem:[#allocation2 + $0x62] sm:$0xff] %vm297_vm2, %v255_v63  ;;  %v363_v5 = vmul.f32 6.790611, %v1431_v4  ;;  %v370_v25 = vmul.f32 6.790611, %v1462_v24 }
  0xe7   : > { %v261_v6 = vpop.permute.xlu1 %260  ;;  %v259_v7 = vpop.permute.xlu0 %258  ;;  %v1509_v33 = vmul.f32 0.84882635, %v1431_v4  ;;  %v631_v58 = vld [vmem:[#allocation2 + $0x21] sm:$0xff]  ;;  %v644_v62 = vmul.f32 6.790611, %v628_v52  ;;  %v598_v0 = vld [vmem:[#allocation2 + $0x18] sm:$0xff] }
  0xe8   : > { %403 = vrot.lane.b32.xlu0 %v363_v5, %s1174_s27  ;;  %295 = vst.msk [vmem:[#allocation2 + $0x7a] sm:$0xff] %vm280_vm1, %v261_v6  ;;  %294 = vst.msk [vmem:[#allocation2 + $0x72] sm:$0xff] %vm280_vm1, %v259_v7  ;;  %v595_v35 = vld [vmem:[#allocation2] sm:$0xff] }
  0xe9   : > { %v333_v10 = vld [vmem:[#allocation2 + $0x5a] sm:$0xff]  ;;  %v1441_v12 = vld [vmem:[#allocation2 + $0x52] sm:$0xff]  ;;  %312 = vst.msk [vmem:[#allocation2 + $0x7a] sm:$0xff] %vm297_vm2, %v261_v6  ;;  %311 = vst.msk [vmem:[#allocation2 + $0x72] sm:$0xff] %vm297_vm2, %v259_v7  ;;  %v611_v43 = vmul.f32 0.84882635, %v595_v35 }
  0xea   : > { %v365_v14 = vmul.f32 6.790611, %v333_v10  ;;  %v364_v15 = vmul.f32 6.790611, %v1441_v12  ;;  %v627_v36 = vld [vmem:[#allocation2 + $0x1] sm:$0xff]  ;;  %v630_v2 = vld [vmem:[#allocation2 + $0x19] sm:$0xff] }
  0xeb   : > { %v1518_v38 = vmul.f32 0.84882635, %v333_v10  ;;  %v643_v44 = vmul.f32 6.790611, %v627_v36  ;;  %v647_v6 = vmul.f32 6.790611, %v631_v58 }
  0xec   : > { %407 = vrot.lane.b32.xlu0 %v365_v14, %s1174_s27  ;;  %405 = vrot.lane.b32.xlu1 %v364_v15, %s1174_s27  ;;  %v601_v7 = vld [vmem:[#allocation2 + $0x30] sm:$0xff] }
  0xed   : > { %v1448_v16 = vld [vmem:[#allocation2 + $0x6a] sm:$0xff]  ;;  %v1450_v17 = vld [vmem:[#allocation2 + $0x62] sm:$0xff]  ;;  %v659_v56 = vsub.f32 %v611_v43, %v643_v44 }
  0xee   : > { %v367_v18 = vmul.f32 6.790611, %v1448_v16  ;;  %v366_v19 = vmul.f32 6.790611, %v1450_v17  ;;  %v1531_v55 = vmul.f32 0.84882635, %v1450_v17 }
  0xef   : > { %v633_v10 = vld [vmem:[#allocation2 + $0x31] sm:$0xff]  ;;  %v679_v17 = vld [vmem:[#allocation2 + $0x23] sm:$0xff] }
  0xf0   : > { %411 = vrot.lane.b32.xlu0 %v367_v18, %s1174_s27  ;;  %409 = vrot.lane.b32.xlu1 %v366_v19, %s1174_s27  ;;  %v1456_v20 = vld [vmem:[#allocation2 + $0x7a] sm:$0xff]  ;;  %v1458_v21 = vld [vmem:[#allocation2 + $0x72] sm:$0xff]  ;;  %v649_v35 = vmul.f32 6.790611, %v633_v10  ;;  %v632_v36 = vld [vmem:[#allocation2 + $0x29] sm:$0xff] }
  0xf1   : > { %v369_v22 = vmul.f32 6.790611, %v1456_v20  ;;  %v368_v23 = vmul.f32 6.790611, %v1458_v21  ;;  %v695_v40 = vmul.f32 6.790611, %v679_v17 }
  0xf2   : > { %v635_v43 = vld [vmem:[#allocation2 + $0x49] sm:$0xff]  ;;  %v648_v52 = vmul.f32 6.790611, %v632_v36  ;;  %v636_v17 = vld [vmem:[#allocation2 + $0x51] sm:$0xff] }
  0xf4   : > { %415 = vrot.lane.b32.xlu0 %v369_v22, %s1174_s27  ;;  %413 = vrot.lane.b32.xlu1 %v368_v23, %s1174_s27 }
  0xf8   : > { %451 = vrot.lane.b32.xlu0 %v1377_v42, %s1175_s28  ;;  %417 = vrot.lane.b32.xlu1 %v370_v25, %s1174_s27  ;;  %v1521_v42 = vmul.f32 0.84882635, %v1441_v12  ;;  %v1540_v12 = vmul.f32 0.84882635, %v1456_v20  ;;  %v600_v20 = vld [vmem:[#allocation2 + $0x28] sm:$0xff] }
  0xfa   : > { %1900 = vst [vmem:[#allocation10_spill] sm:$0xff] %v1540_v12 }
  0xfc   : > { %455 = vrot.lane.b32.xlu0 %v1395_v48, %s1175_s28  ;;  %453 = vrot.lane.b32.xlu1 %v1374_v41, %s1175_s28  ;;  %v629_v41 = vld [vmem:[#allocation2 + $0x11] sm:$0xff] }
  0xfd   : > { %v677_v48 = vld [vmem:[#allocation2 + $0x13] sm:$0xff]  ;;  %v645_v51 = vmul.f32 6.790611, %v629_v41  ;;  %v603_v41 = vld [vmem:[#allocation2 + $0x48] sm:$0xff] }
  0xfe   : > { %v693_v59 = vmul.f32 6.790611, %v677_v48 }
  0xff   : > { %v661_v4 = vsub.f32 %v613_v50, %v645_v51  ;;  %v680_v50 = vld [vmem:[#allocation2 + $0x2b] sm:$0xff]  ;;  %v616_v51 = vmul.f32 0.84882635, %v600_v20 }
 0x100   : > { %459 = vrot.lane.b32.xlu0 %v359_v54, %s1175_s28  ;;  %457 = vrot.lane.b32.xlu1 %v1392_v47, %s1175_s28  ;;  %v739_v47 = vmul.f32 0.84882635, %v723_v39  ;;  %v1528_v54 = vmul.f32 0.84882635, %v1448_v16  ;;  %v724_v16 = vld [vmem:[#allocation2 + $0xc] sm:$0xff] }
 0x101   : > { %v709_v37 = vadd.f32 %v693_v59, %v661_v4  ;;  %v696_v4 = vmul.f32 6.790611, %v680_v50  ;;  %v728_v20 = vld [vmem:[#allocation2 + $0x2c] sm:$0xff] }
 0x102   : > { %1899 = vst [vmem:[#allocation9_spill] sm:$0xff] %v1528_v54 }
 0x104   : > { %463 = vrot.lane.b32.xlu0 %v361_v61, %s1175_s28  ;;  %461 = vrot.lane.b32.xlu1 %v1410_v53, %s1175_s28  ;;  %v676_v53 = vld [vmem:[#allocation2 + $0xb] sm:$0xff]  ;;  %v612_v61 = vmul.f32 0.84882635, %v596_v45  ;;  %v1550_v45 = vmul.f32 0.84882635, %v1462_v24 }
 0x105   : > { %v692_v63 = vmul.f32 6.790611, %v676_v53  ;;  %v602_v53 = vld [vmem:[#allocation2 + $0x38] sm:$0xff]  ;;  %v619_v24 = vmul.f32 0.84882635, %v603_v41 }
 0x106   : > { %1902 = vst [vmem:[#allocation12_spill] sm:$0xff] %v1550_v45  ;;  %v618_v10 = vmul.f32 0.84882635, %v602_v53  ;;  %v682_v41 = vld [vmem:[#allocation2 + $0x3b] sm:$0xff] }
 0x107   : > { %v638_v53 = vld [vmem:[#allocation2 + $0x61] sm:$0xff] }
 0x108   : > { %467 = vrot.lane.b32.xlu0 %v363_v5, %s1175_s28  ;;  %465 = vrot.lane.b32.xlu1 %v362_v60, %s1175_s28  ;;  %v1533_v60 = vmul.f32 0.84882635, %v725_v49  ;;  %v615_v5 = vmul.f32 0.84882635, %v599_v57  ;;  %v681_v49 = vld [vmem:[#allocation2 + $0x33] sm:$0xff]  ;;  %v727_v57 = vld [vmem:[#allocation2 + $0x24] sm:$0xff] }
 0x10a   : > { %v663_v39 = vsub.f32 %v615_v5, %v647_v6  ;;  %v683_v5 = vld [vmem:[#allocation2 + $0x4b] sm:$0xff] }
 0x10c   : > { %471 = vrot.lane.b32.xlu0 %v365_v14, %s1175_s28  ;;  %469 = vrot.lane.b32.xlu1 %v364_v15, %s1175_s28  ;;  %v1543_v14 = vmul.f32 0.84882635, %v1458_v21  ;;  %v707_v15 = vadd.f32 %v691_v46, %v659_v56  ;;  %v740_v21 = vmul.f32 0.84882635, %v724_v16  ;;  %v634_v56 = vld [vmem:[#allocation2 + $0x39] sm:$0xff]  ;;  %v604_v16 = vld [vmem:[#allocation2 + $0x50] sm:$0xff] }
 0x10e   : > { %1901 = vst [vmem:[#allocation11_spill] sm:$0xff] %v1543_v14  ;;  %v755_v44 = vsub.f32 %v707_v15, %v739_v47  ;;  %v726_v47 = vld [vmem:[#allocation2 + $0x1c] sm:$0xff]  ;;  %v650_v15 = vmul.f32 6.790611, %v634_v56  ;;  %v744_v56 = vmul.f32 0.84882635, %v728_v20 }
 0x110   : > { %475 = vrot.lane.b32.xlu0 %v367_v18, %s1175_s28  ;;  %473 = vrot.lane.b32.xlu1 %v366_v19, %s1175_s28  ;;  %v614_v18 = vmul.f32 0.84882635, %v598_v0  ;;  %v646_v19 = vmul.f32 6.790611, %v630_v2  ;;  %v697_v0 = vmul.f32 6.790611, %v681_v49  ;;  %v666_v49 = vsub.f32 %v618_v10, %v650_v15 }
 0x111   : > { %v729_v2 = vld [vmem:[#allocation2 + $0x34] sm:$0xff] }
 0x112   : > { %v662_v58 = vsub.f32 %v614_v18, %v646_v19  ;;  %v664_v18 = vsub.f32 %v616_v51, %v648_v52  ;;  %v605_v19 = vld [vmem:[#allocation2 + $0x58] sm:$0xff]  ;;  %v606_v52 = vld [vmem:[#allocation2 + $0x60] sm:$0xff] }
 0x113   : > { %v621_v50 = vmul.f32 0.84882635, %v605_v19  ;;  %v641_v19 = vld [vmem:[#allocation2 + $0x79] sm:$0xff] }
 0x114   : > { %479 = vrot.lane.b32.xlu0 %v369_v22, %s1175_s28  ;;  %477 = vrot.lane.b32.xlu1 %v368_v23, %s1175_s28  ;;  %v678_v22 = vld [vmem:[#allocation2 + $0x1b] sm:$0xff]  ;;  %v660_v23 = vsub.f32 %v612_v61, %v644_v62  ;;  %v651_v61 = vmul.f32 6.790611, %v635_v43  ;;  %v757_v62 = vsub.f32 %v709_v37, %v1533_v60  ;;  %v699_v37 = vmul.f32 6.790611, %v683_v5 }
 0x115   : > { %v694_v48 = vmul.f32 6.790611, %v678_v22  ;;  %v743_v22 = vmul.f32 0.84882635, %v727_v57  ;;  %v685_v43 = vld [vmem:[#allocation2 + $0x5b] sm:$0xff] }
 0x116   : > { %v708_v46 = vadd.f32 %v692_v63, %v660_v23  ;;  %v711_v63 = vadd.f32 %v695_v40, %v663_v39  ;;  %v742_v23 = vmul.f32 0.84882635, %v726_v47  ;;  %v667_v36 = vsub.f32 %v619_v24, %v651_v61  ;;  %v607_v47 = vld [vmem:[#allocation2 + $0x68] sm:$0xff] }
 0x117   : > { %v712_v40 = vadd.f32 %v696_v4, %v664_v18  ;;  %v698_v61 = vmul.f32 6.790611, %v682_v41  ;;  %v733_v4 = vld [vmem:[#allocation2 + $0x5c] sm:$0xff] }
 0x118   : > { %531 = vrot.lane.b32.xlu0 %v1474_v26, %s1176_s29  ;;  %481 = vrot.lane.b32.xlu1 %v370_v25, %s1175_s28  ;;  %v617_v25 = vmul.f32 0.84882635, %v601_v7  ;;  %v756_v6 = vsub.f32 %v708_v46, %v740_v21  ;;  %v710_v7 = vadd.f32 %v694_v48, %v662_v58  ;;  %v731_v21 = vld [vmem:[#allocation2 + $0x4c] sm:$0xff]  ;;  %v759_v39 = vsub.f32 %v711_v63, %v743_v22 }
 0x119   : > { %v652_v46 = vmul.f32 6.790611, %v636_v17  ;;  %v747_v57 = vmul.f32 0.84882635, %v731_v21  ;;  %v684_v58 = vld [vmem:[#allocation2 + $0x53] sm:$0xff]  ;;  %v715_v24 = vadd.f32 %v699_v37, %v667_v36  ;;  %v639_v63 = vld [vmem:[#allocation2 + $0x69] sm:$0xff]  ;;  %v714_v10 = vadd.f32 %v698_v61, %v666_v49 }
 0x11a   : > { %v665_v59 = vsub.f32 %v617_v25, %v649_v35  ;;  %v637_v25 = vld [vmem:[#allocation2 + $0x59] sm:$0xff]  ;;  %v745_v35 = vmul.f32 0.84882635, %v729_v2  ;;  %v758_v48 = vsub.f32 %v710_v7, %v742_v23  ;;  %v654_v7 = vmul.f32 6.790611, %v638_v53  ;;  %v687_v22 = vld [vmem:[#allocation2 + $0x6b] sm:$0xff] }
 0x11b   : > { %v653_v51 = vmul.f32 6.790611, %v637_v25  ;;  %v730_v2 = vld [vmem:[#allocation2 + $0x3c] sm:$0xff]  ;;  %v623_v17 = vmul.f32 0.84882635, %v607_v47  ;;  %v608_v25 = vld [vmem:[#allocation2 + $0x70] sm:$0xff] }
 0x11c   : > { %535 = vrot.lane.b32.xlu0 %v1479_v27, %s1176_s29  ;;  %533 = vrot.lane.b32.xlu1 %v1482_v28, %s1176_s29  ;;  %v713_v60 = vadd.f32 %v697_v0, %v665_v59  ;;  %v760_v0 = vsub.f32 %v712_v40, %v744_v56  ;;  %v609_v23 = vld [vmem:[#allocation2 + $0x78] sm:$0xff]  ;;  %v655_v18 = vmul.f32 6.790611, %v639_v63  ;;  %v746_v20 = vmul.f32 0.84882635, %v730_v2  ;;  %v610_v56 = vld [vmem:[#allocation2 + $0x80] sm:$0xff] }
 0x11d   : > { %v669_v15 = vsub.f32 %v621_v50, %v653_v51  ;;  %v749_v37 = vmul.f32 0.84882635, %v733_v4  ;;  %v732_v21 = vld [vmem:[#allocation2 + $0x54] sm:$0xff]  ;;  %v703_v41 = vmul.f32 6.790611, %v687_v22 }
 0x11e   : > { %v761_v59 = vsub.f32 %v713_v60, %v745_v35  ;;  %v640_v60 = vld [vmem:[#allocation2 + $0x71] sm:$0xff]  ;;  %v763_v35 = vsub.f32 %v715_v24, %v747_v57  ;;  %v624_v49 = vmul.f32 0.84882635, %v608_v25  ;;  %v748_v51 = vmul.f32 0.84882635, %v732_v21  ;;  %v689_v63 = vld [vmem:[#allocation2 + $0x7b] sm:$0xff] }
 0x11f   : > { %v656_v50 = vmul.f32 6.790611, %v640_v60  ;;  %v735_v57 = vld [vmem:[#allocation2 + $0x6c] sm:$0xff]  ;;  %v737_v25 = vld [vmem:[#allocation2 + $0x7c] sm:$0xff]  ;;  %v736_v60 = vld [vmem:[#allocation2 + $0x74] sm:$0xff] }
 0x120   : > { %539 = vrot.lane.b32.xlu0 %v1489_v29, %s1176_s29  ;;  %537 = vrot.lane.b32.xlu1 %v1492_v30, %s1176_s29 }
 0x124   : > { %543 = vrot.lane.b32.xlu0 %v1499_v31, %s1176_s29  ;;  %541 = vrot.lane.b32.xlu1 %v1502_v32, %s1176_s29 }
 0x128   : > { %547 = vrot.lane.b32.xlu0 %v1509_v33, %s1176_s29  ;;  %545 = vrot.lane.b32.xlu1 %v1512_v34, %s1176_s29 }
 0x12c   : > { %551 = vrot.lane.b32.xlu0 %v1518_v38, %s1176_s29  ;;  %549 = vrot.lane.b32.xlu1 %v1521_v42, %s1176_s29 }
 0x130   : > { %555 = vrot.lane.b32.xlu0 %v1528_v54, %s1176_s29  ;;  %553 = vrot.lane.b32.xlu1 %v1531_v55, %s1176_s29 }
 0x134   : > { %559 = vrot.lane.b32.xlu0 %v1540_v12, %s1176_s29  ;;  %557 = vrot.lane.b32.xlu1 %v1543_v14, %s1176_s29 }
 0x138   : > { %803 = vrot.lane.b32.xlu0 %v755_v44, %s1177_s2  ;;  %561 = vrot.lane.b32.xlu1 %v1550_v45, %s1176_s29  ;;  %v620_v44 = vmul.f32 0.84882635, %v604_v16  ;;  %v700_v16 = vmul.f32 6.790611, %v684_v58  ;;  %v642_v58 = vld [vmem:[#allocation2 + $0x81] sm:$0xff] }
 0x13a   : > { %v668_v5 = vsub.f32 %v620_v44, %v652_v46  ;;  %v625_v44 = vmul.f32 0.84882635, %v609_v23  ;;  %v762_v46 = vsub.f32 %v714_v10, %v746_v20  ;;  %v658_v10 = vmul.f32 6.790611, %v642_v58 }
 0x13b   : > { %v705_v23 = vmul.f32 6.790611, %v689_v63 }
 0x13c   : > { %807 = vrot.lane.b32.xlu0 %v757_v62, %s1177_s2  ;;  %805 = vrot.lane.b32.xlu1 %v756_v6, %s1177_s2  ;;  %v701_v62 = vmul.f32 6.790611, %v685_v43  ;;  %v622_v6 = vmul.f32 0.84882635, %v606_v52  ;;  %v716_v40 = vadd.f32 %v700_v16, %v668_v5  ;;  %v671_v52 = vsub.f32 %v623_v17, %v655_v18 }
 0x13d   : > { %v751_v17 = vmul.f32 0.84882635, %v735_v57 }
 0x13e   : > { %v717_v36 = vadd.f32 %v701_v62, %v669_v15  ;;  %v670_v43 = vsub.f32 %v622_v6, %v654_v7  ;;  %v719_v24 = vadd.f32 %v703_v41, %v671_v52  ;;  %v734_v62 = vld [vmem:[#allocation2 + $0x64] sm:$0xff]  ;;  %v672_v6 = vsub.f32 %v624_v49, %v656_v50 }
 0x13f   : > { %v626_v7 = vmul.f32 0.84882635, %v610_v56  ;;  %v750_v22 = vmul.f32 0.84882635, %v734_v62  ;;  %v738_v49 = vld [vmem:[#allocation2 + $0x84] sm:$0xff] }
 0x140   : > { %811 = vrot.lane.b32.xlu0 %v759_v39, %s1177_s2  ;;  %809 = vrot.lane.b32.xlu1 %v758_v48, %s1177_s2  ;;  %v686_v39 = vld [vmem:[#allocation2 + $0x63] sm:$0xff]  ;;  %v657_v48 = vmul.f32 6.790611, %v641_v19  ;;  %v765_v47 = vsub.f32 %v717_v36, %v749_v37  ;;  %v767_v19 = vsub.f32 %v719_v24, %v751_v17 }
 0x141   : > { %v702_v53 = vmul.f32 6.790611, %v686_v39 }
 0x142   : > { %v673_v5 = vsub.f32 %v625_v44, %v657_v48  ;;  %v753_v44 = vmul.f32 0.84882635, %v737_v25 }
 0x143   : > { %v718_v61 = vadd.f32 %v702_v53, %v670_v43 }
 0x144   : > { %815 = vrot.lane.b32.xlu0 %v761_v59, %s1177_s2  ;;  %813 = vrot.lane.b32.xlu1 %v760_v0, %s1177_s2  ;;  %v764_v59 = vsub.f32 %v716_v40, %v748_v51  ;;  %v688_v0 = vld [vmem:[#allocation2 + $0x73] sm:$0xff]  ;;  %v721_v21 = vadd.f32 %v705_v23, %v673_v5  ;;  %v674_v40 = vsub.f32 %v626_v7, %v658_v10 }
 0x145   : > { %v704_v18 = vmul.f32 6.790611, %v688_v0  ;;  %v766_v37 = vsub.f32 %v718_v61, %v750_v22 }
 0x146   : > { %v769_v52 = vsub.f32 %v721_v21, %v753_v44 }
 0x147   : > { %v720_v39 = vadd.f32 %v704_v18, %v672_v6 }
 0x148   : > { %819 = vrot.lane.b32.xlu0 %v763_v35, %s1177_s2  ;;  %817 = vrot.lane.b32.xlu1 %v762_v46, %s1177_s2  ;;  %v690_v35 = vld [vmem:[#allocation2 + $0x83] sm:$0xff]  ;;  %v752_v46 = vmul.f32 0.84882635, %v736_v60 }
 0x149   : > { %v1564_v2 = vpop.permute.xlu1 %389  ;;  %v706_v48 = vmul.f32 6.790611, %v690_v35 }
 0x14a   : > { %v1566_v4 = vpop.permute.xlu0 %387  ;;  %v768_v53 = vsub.f32 %v720_v39, %v752_v46  ;;  %v1914_v14 = vsub.f32 %v1482_v28, %v1564_v2 }
 0x14b   : > { %v722_v56 = vadd.f32 %v706_v48, %v674_v40 }
 0x14c   : > { %823 = vrot.lane.b32.xlu0 %v765_v47, %s1177_s2  ;;  %821 = vrot.lane.b32.xlu1 %v764_v59, %s1177_s2  ;;  %v754_v47 = vmul.f32 0.84882635, %v738_v49 }
 0x14d   : > { %v1574_v20 = vpop.permute.xlu1 %393 }
 0x14e   : > { %v1576_v36 = vpop.permute.xlu0 %391  ;;  %v770_v61 = vsub.f32 %v722_v56, %v754_v47 }
 0x150   : > { %827 = vrot.lane.b32.xlu0 %v767_v19, %s1177_s2  ;;  %825 = vrot.lane.b32.xlu1 %v766_v37, %s1177_s2 }
 0x152   : > { %v1584_v50 = vpop.permute.xlu1 %397  ;;  %v1586_v51 = vpop.permute.xlu0 %395 }
 0x154   : > { %831 = vrot.lane.b32.xlu0 %v769_v52, %s1177_s2  ;;  %829 = vrot.lane.b32.xlu1 %v768_v53, %s1177_s2 }
 0x156   : > { %v1594_v59 = vpop.permute.xlu1 %401  ;;  %v1596_v24 = vpop.permute.xlu0 %399 }
 0x158   : > { %833 = vrot.lane.b32.xlu1 %v770_v61, %s1177_s2 }
 0x15a   : > { %v1603_v0 = vpop.permute.xlu0 %403 }
 0x15e   : > { %v1607_v6 = vpop.permute.xlu1 %405  ;;  %v1609_v7 = vpop.permute.xlu0 %407 }
 0x162   : > { %v1615_v22 = vpop.permute.xlu1 %409  ;;  %v1617_v23 = vpop.permute.xlu0 %411 }
 0x163   : > { %1903 = vst [vmem:[#allocation13_spill] sm:$0xff] %v1617_v23  ;;  %v1915_v23 = vsub.f32 %v1479_v27, %v1576_v36  ;;  %v1917_v27 = vsub.f32 %v1489_v29, %v1586_v51 }
 0x166   : > { %v1623_v25 = vpop.permute.xlu1 %413  ;;  %v1625_v60 = vpop.permute.xlu0 %415 }
 0x167   : > { %1904 = vst [vmem:[#allocation14_spill] sm:$0xff] %v1623_v25  ;;  %1905 = vst [vmem:[#allocation15_spill] sm:$0xff] %v1625_v60 }
 0x16a   : > { %v1631_v21 = vpop.permute.xlu1 %417  ;;  %v452_v39 = vpop.permute.xlu0 %451 }
 0x16b   : > { %1906 = vst [vmem:[#allocation16_spill] sm:$0xff] %v1631_v21 }
 0x16e   : > { %v454_v44 = vpop.permute.xlu1 %453  ;;  %v456_v46 = vpop.permute.xlu0 %455 }
 0x172   : > { %v458_v48 = vpop.permute.xlu1 %457  ;;  %v460_v49 = vpop.permute.xlu0 %459 }
 0x176   : > { %v462_v52 = vpop.permute.xlu1 %461  ;;  %v464_v53 = vpop.permute.xlu0 %463 }
 0x17a   : > { %v1635_v56 = vpop.permute.xlu1 %465  ;;  %v1637_v47 = vpop.permute.xlu0 %467 }
 0x17e   : > { %v1639_v61 = vpop.permute.xlu1 %469  ;;  %v1641_v35 = vpop.permute.xlu0 %471 }
 0x182   : > { %v1643_v37 = vpop.permute.xlu1 %473  ;;  %v1645_v19 = vpop.permute.xlu0 %475 }
 0x183   : > { %1907 = vst [vmem:[#allocation17_spill] sm:$0xff] %v1645_v19  ;;  %v500_v19 = vadd.f32 %v454_v44, %v1914_v14  ;;  %v503_v14 = vadd.f32 %v460_v49, %v1917_v27 }
 0x186   : > { %v1647_v18 = vpop.permute.xlu1 %477  ;;  %v1649_v40 = vpop.permute.xlu0 %479 }
 0x187   : > { %1908 = vst [vmem:[#allocation18_spill] sm:$0xff] %v1647_v18  ;;  %1909 = vst [vmem:[#allocation19_spill] sm:$0xff] %v1649_v40 }
 0x18a   : > { %v1651_v17 = vpop.permute.xlu1 %481  ;;  %v532_v10 = vpop.permute.xlu0 %531 }
 0x18b   : > { %1910 = vst [vmem:[#allocation20_spill] sm:$0xff] %v1651_v17  ;;  %v1913_v17 = vsub.f32 %v1474_v26, %v1566_v4 }
 0x18d   : > { %v499_v60 = vadd.f32 %v452_v39, %v1913_v17 }
 0x18e   : > { %v534_v5 = vpop.permute.xlu1 %533  ;;  %v536_v62 = vpop.permute.xlu0 %535 }
 0x18f   : > { %v579_v25 = vsub.f32 %v499_v60, %v532_v10  ;;  %v580_v54 = vsub.f32 %v500_v19, %v534_v5  ;;  %v1916_v10 = vsub.f32 %v1492_v30, %v1574_v20  ;;  %v1918_v30 = vsub.f32 %v1502_v32, %v1584_v50 }
 0x190   : > { %v1919_v20 = vsub.f32 %v1499_v31, %v1596_v24  ;;  %v1720_v31 = vld [vmem:[%s1294_s30 + $0x58] sm:$0xff]  ;;  %v1920_v24 = vsub.f32 %v1512_v34, %v1594_v59  ;;  %v1738_v34 = vld [vmem:[%s1294_s30 + $0x30] sm:$0xff] }
 0x191   : > { %v771_v4 = vmul.f32 %v579_v25, %v1302_v1  ;;  %v502_v28 = vadd.f32 %v458_v48, %v1916_v10  ;;  %v772_v36 = vmul.f32 %v580_v54, %v1307_v3  ;;  %v1690_v1 = vld [vmem:[%s1294_s30 + $0x10] sm:$0xff]  ;;  %v504_v54 = vadd.f32 %v462_v52, %v1918_v30  ;;  %v1926_v30 = vld [vmem:[#allocation13_spill] sm:$0xff] }
 0x192   : > { %v538_v63 = vpop.permute.xlu1 %537  ;;  %v540_v58 = vpop.permute.xlu0 %539  ;;  %v505_v51 = vadd.f32 %v464_v53, %v1919_v20  ;;  %v506_v48 = vadd.f32 %v1635_v56, %v1920_v24  ;;  %v1922_v10 = vsub.f32 %v1521_v42, %v1607_v6  ;;  %v1068_v42 = vld [vmem:[%s1294_s30] sm:$0xff] }
 0x193   : > { %v582_v5 = vsub.f32 %v502_v28, %v538_v63  ;;  %v1708_v63 = vld [vmem:[%s1294_s30 + $0x18] sm:$0xff]  ;;  %v1923_v28 = vsub.f32 %v1518_v38, %v1609_v7 }
 0x194   : > { %v1069_v38 = vld [vmem:[%s1294_s30 + $0x78] sm:$0xff] }
 0x195   : > { %v774_v25 = vmul.f32 %v1708_v63, %v582_v5  ;;  %v509_v27 = vadd.f32 %v1641_v35, %v1923_v28  ;;  %v1070_v35 = vld [vmem:[%s1294_s30 + $0x40] sm:$0xff] }
 0x196   : > { %v542_v57 = vpop.permute.xlu1 %541  ;;  %v544_v41 = vpop.permute.xlu0 %543 }
 0x197   : > { %v584_v60 = vsub.f32 %v504_v54, %v542_v57  ;;  %v585_v32 = vsub.f32 %v505_v51, %v544_v41  ;;  %v1921_v41 = vsub.f32 %v1509_v33, %v1603_v0  ;;  %v1747_v0 = vld [vmem:[%s1294_s30 + $0x68] sm:$0xff]  ;;  %v1928_v54 = vld [vmem:[#allocation17_spill] sm:$0xff] }
 0x199   : > { %v507_v49 = vadd.f32 %v1637_v47, %v1921_v41  ;;  %v777_v59 = vmul.f32 %v1738_v34, %v585_v32  ;;  %v1932_v41 = vld [vmem:[#allocation14_spill] sm:$0xff] }
 0x19a   : > { %v1653_v43 = vpop.permute.xlu1 %545  ;;  %v1655_v15 = vpop.permute.xlu0 %547 }
 0x19b   : > { %v587_v33 = vsub.f32 %v507_v49, %v1655_v15  ;;  %v508_v15 = vadd.f32 %v1639_v61, %v1922_v10 }
 0x19d   : > { %v779_v6 = vmul.f32 %v1068_v42, %v587_v33 }
 0x19e   : > { %v1657_v16 = vpop.permute.xlu1 %549  ;;  %v1659_v21 = vpop.permute.xlu0 %551 }
 0x19f   : > { %v589_v61 = vsub.f32 %v509_v27, %v1659_v21 }
 0x1a1   : > { %v781_v32 = vmul.f32 %v1690_v1, %v589_v61 }
 0x1a2   : > { %v1661_v45 = vpop.permute.xlu1 %553  ;;  %v1663_v40 = vpop.permute.xlu0 %555 }
 0x1a3   : > { %1911 = vst [vmem:[#allocation21_spill] sm:$0xff] %v1661_v45  ;;  %1912 = vst [vmem:[#allocation22_spill] sm:$0xff] %v1663_v40  ;;  %v501_v45 = vadd.f32 %v456_v46, %v1915_v23  ;;  %v1712_v46 = vld [vmem:[%s1294_s30 + $0x20] sm:$0xff] }
 0x1a5   : > { %v581_v17 = vsub.f32 %v501_v45, %v536_v62  ;;  %v583_v45 = vsub.f32 %v503_v14, %v540_v58 }
 0x1a6   : > { %v1668_v12 = vpop.permute.xlu1 %557  ;;  %v1670_v18 = vpop.permute.xlu0 %559 }
 0x1aa   : > { %v1678_v40 = vpop.permute.xlu1 %561  ;;  %v804_v26 = vpop.permute.xlu0 %803 }
 0x1ab   : > { %v851_v39 = vmul.f32 %v804_v26, %v1318_v9  ;;  %v773_v9 = vmul.f32 %v1690_v1, %v581_v17  ;;  %v1733_v26 = vld [vmem:[%s1294_s30 + $0x28] sm:$0xff]  ;;  %v586_v17 = vsub.f32 %v506_v48, %v1653_v43  ;;  %v1751_v43 = vld [vmem:[%s1294_s30 + $0x70] sm:$0xff] }
 0x1ac   : > { %v1931_v48 = vld [vmem:[#allocation11_spill] sm:$0xff] }
 0x1ad   : > { %v867_v2 = vadd.f32 %v851_v39, %v771_v4  ;;  %v776_v4 = vmul.f32 %v1733_v26, %v584_v60  ;;  %v1929_v60 = vld [vmem:[#allocation21_spill] sm:$0xff]  ;;  %v1933_v49 = vsub.f32 %v1931_v48, %v1932_v41  ;;  %v1936_v1 = vld [vmem:[#allocation15_spill] sm:$0xff] }
 0x1ae   : > { %v806_v23 = vpop.permute.xlu1 %805  ;;  %v808_v19 = vpop.permute.xlu0 %807 }
 0x1af   : > { %884 = vst.msk [vmem:[%s1695_s3] sm:$0xff] %vm883_vm4, %v867_v2  ;;  %v852_v29 = vmul.f32 %v806_v23, %v1315_v8  ;;  %v853_v3 = vmul.f32 %v808_v19, %v1324_v11  ;;  %v775_v11 = vmul.f32 %v1712_v46, %v583_v45  ;;  %v588_v23 = vsub.f32 %v508_v15, %v1657_v16 }
 0x1b0   : > { %v1924_v16 = vsub.f32 %v1531_v55, %v1615_v22  ;;  %v1072_v22 = vld [vmem:[%s1294_s30 + $0x48] sm:$0xff] }
 0x1b1   : > { %v868_v58 = vadd.f32 %v852_v29, %v772_v36  ;;  %v869_v62 = vadd.f32 %v853_v3, %v773_v9  ;;  %v1763_v36 = vld [vmem:[%s1294_s30 + $0x38] sm:$0xff]  ;;  %v1925_v3 = vld [vmem:[#allocation9_spill] sm:$0xff] }
 0x1b2   : > { %v810_v8 = vpop.permute.xlu1 %809  ;;  %v812_v44 = vpop.permute.xlu0 %811  ;;  %v778_v5 = vmul.f32 %v1763_v36, %v586_v17  ;;  %v510_v29 = vadd.f32 %v1643_v37, %v1924_v16  ;;  %v1927_v21 = vsub.f32 %v1925_v3, %v1926_v30 }
 0x1b3   : > { %885 = vst.msk [vmem:[%s1695_s3 + $0x8] sm:$0xff] %vm883_vm4, %v868_v58  ;;  %886 = vst.msk [vmem:[%s1695_s3 + $0x10] sm:$0xff] %vm883_vm4, %v869_v62  ;;  %v854_v50 = vmul.f32 %v1720_v31, %v810_v8  ;;  %v855_v57 = vmul.f32 %v812_v44, %v1329_v13  ;;  %v1071_v62 = vld [vmem:[%s1294_s30 + $0x8] sm:$0xff] }
 0x1b4   : > { %v511_v20 = vadd.f32 %v1928_v54, %v1927_v21  ;;  %v590_v8 = vsub.f32 %v510_v29, %v1929_v60 }
 0x1b5   : > { %v870_v52 = vadd.f32 %v854_v50, %v774_v25  ;;  %v871_v53 = vadd.f32 %v855_v57, %v775_v11  ;;  %v780_v25 = vmul.f32 %v1071_v62, %v588_v23  ;;  %v1930_v50 = vld [vmem:[#allocation22_spill] sm:$0xff]  ;;  %v1073_v57 = vld [vmem:[%s1294_s30 + $0x50] sm:$0xff]  ;;  %v1940_v23 = vld [vmem:[#allocation16_spill] sm:$0xff] }
 0x1b6   : > { %v814_v13 = vpop.permute.xlu1 %813  ;;  %v816_v39 = vpop.permute.xlu0 %815  ;;  %v591_v55 = vsub.f32 %v511_v20, %v1930_v50 }
 0x1b7   : > { %887 = vst.msk [vmem:[%s1695_s3 + $0x18] sm:$0xff] %vm883_vm4, %v870_v52  ;;  %888 = vst.msk [vmem:[%s1695_s3 + $0x20] sm:$0xff] %vm883_vm4, %v871_v53  ;;  %v856_v56 = vmul.f32 %v1747_v0, %v814_v13  ;;  %v857_v47 = vmul.f32 %v1751_v43, %v816_v39  ;;  %v1934_v52 = vld [vmem:[#allocation18_spill] sm:$0xff]  ;;  %v1938_v13 = vld [vmem:[#allocation19_spill] sm:$0xff] }
 0x1b8   : > { %v512_v53 = vadd.f32 %v1934_v52, %v1933_v49  ;;  %v783_v28 = vmul.f32 %v1712_v46, %v591_v55 }
 0x1b9   : > { %v872_v14 = vadd.f32 %v856_v56, %v776_v4  ;;  %v873_v2 = vadd.f32 %v857_v47, %v777_v59  ;;  %v1935_v4 = vld [vmem:[#allocation10_spill] sm:$0xff]  ;;  %v782_v56 = vmul.f32 %v1708_v63, %v590_v8  ;;  %v1939_v63 = vld [vmem:[#allocation12_spill] sm:$0xff] }
 0x1ba   : > { %v818_v19 = vpop.permute.xlu1 %817  ;;  %v820_v9 = vpop.permute.xlu0 %819  ;;  %v1937_v17 = vsub.f32 %v1935_v4, %v1936_v1  ;;  %v592_v47 = vsub.f32 %v512_v53, %v1668_v12  ;;  %v1941_v12 = vsub.f32 %v1939_v63, %v1940_v23 }
 0x1bb   : > { %889 = vst.msk [vmem:[%s1695_s3 + $0x28] sm:$0xff] %vm883_vm4, %v872_v14  ;;  %890 = vst.msk [vmem:[%s1695_s3 + $0x30] sm:$0xff] %vm883_vm4, %v873_v2  ;;  %v858_v7 = vmul.f32 %v1069_v38, %v818_v19  ;;  %v859_v45 = vmul.f32 %v1070_v35, %v820_v9  ;;  %v1074_v2 = vld [vmem:[%s1294_s30 + $0x60] sm:$0xff]  ;;  %v1942_v19 = vld [vmem:[#allocation20_spill] sm:$0xff] }
 0x1bc   : > { %v513_v39 = vadd.f32 %v1938_v13, %v1937_v17  ;;  %v514_v9 = vadd.f32 %v1942_v19, %v1941_v12 }
 0x1bd   : > { %v874_v51 = vadd.f32 %v858_v7, %v778_v5  ;;  %v875_v58 = vadd.f32 %v859_v45, %v779_v6 }
 0x1be   : > { %v822_v44 = vpop.permute.xlu1 %821  ;;  %v824_v11 = vpop.permute.xlu0 %823  ;;  %v593_v27 = vsub.f32 %v513_v39, %v1670_v18  ;;  %v784_v18 = vmul.f32 %v1733_v26, %v592_v47 }
 0x1bf   : > { %891 = vst.msk [vmem:[%s1695_s3 + $0x38] sm:$0xff] %vm883_vm4, %v874_v51  ;;  %892 = vst.msk [vmem:[%s1695_s3 + $0x40] sm:$0xff] %vm883_vm4, %v875_v58  ;;  %v860_v37 = vmul.f32 %v1072_v22, %v822_v44  ;;  %v861_v24 = vmul.f32 %v1073_v57, %v824_v11 }
 0x1c0   : > { %v785_v7 = vmul.f32 %v1738_v34, %v593_v27 }
 0x1c1   : > { %v876_v59 = vadd.f32 %v860_v37, %v780_v25  ;;  %v877_v33 = vadd.f32 %v861_v24, %v781_v32 }
 0x1c2   : > { %v826_v10 = vpop.permute.xlu1 %825  ;;  %v828_v15 = vpop.permute.xlu0 %827 }
 0x1c3   : > { %893 = vst.msk [vmem:[%s1695_s3 + $0x48] sm:$0xff] %vm883_vm4, %v876_v59  ;;  %894 = vst.msk [vmem:[%s1695_s3 + $0x50] sm:$0xff] %vm883_vm4, %v877_v33  ;;  %v862_v14 = vmul.f32 %v1720_v31, %v826_v10  ;;  %v863_v5 = vmul.f32 %v1074_v2, %v828_v15  ;;  %v594_v31 = vsub.f32 %v514_v9, %v1678_v40 }
 0x1c5   : > { %v878_v42 = vadd.f32 %v862_v14, %v782_v56  ;;  %v879_v46 = vadd.f32 %v863_v5, %v783_v28  ;;  %v786_v34 = vmul.f32 %v1763_v36, %v594_v31 }
 0x1c6   : > { %v830_v6 = vpop.permute.xlu1 %829  ;;  %v832_v61 = vpop.permute.xlu0 %831 }
 0x1c7   : > { %895 = vst.msk [vmem:[%s1695_s3 + $0x58] sm:$0xff] %vm883_vm4, %v878_v42  ;;  %896 = vst.msk [vmem:[%s1695_s3 + $0x60] sm:$0xff] %vm883_vm4, %v879_v46  ;;  %v864_v35 = vmul.f32 %v1747_v0, %v830_v6  ;;  %v865_v45 = vmul.f32 %v1751_v43, %v832_v61 }
 0x1c9   : > { %v880_v16 = vadd.f32 %v864_v35, %v784_v18  ;;  %v881_v26 = vadd.f32 %v865_v45, %v785_v7 }
 0x1ca   : > { %v834_v29 = vpop.permute.xlu1 %833 }
 0x1cb   : > { %897 = vst.msk [vmem:[%s1695_s3 + $0x68] sm:$0xff] %vm883_vm4, %v880_v16  ;;  %898 = vst.msk [vmem:[%s1695_s3 + $0x70] sm:$0xff] %vm883_vm4, %v881_v26  ;;  %v866_v40 = vmul.f32 %v1069_v38, %v834_v29 }
 0x1cd   : > { %v882_v0 = vadd.f32 %v866_v40, %v786_v34 }
 0x1cf   : > { %899 = vst.msk [vmem:[%s1695_s3 + $0x78] sm:$0xff] %vm883_vm4, %v882_v0 }
 0x1d0   : > { %1116 = shalt.err (!%p1113_p10)
}
 0x1d1   : > { %s1117_s24 = scalar_lea.hbm %s1834_s14, 2048  ;;  %s1121_s25 = scalar_lea.hbm %s1882_s1, 4096 }
 0x1d2   : > { %p1118_p0 = scmp.ne.s32.totalorder %s1834_s14, %s1117_s24  ;;  %p1122_p1 = scmp.lt.s32.totalorder %s1834_s14, %s1882_s1 }
 0x1d3   : > { %p1123_p3 = scmp.lt.s32.totalorder %s1121_s25, %s1117_s24 }
 0x1d4   : > { %p1119_p2 = pnand %p1118_p0, %p1943_p12 }
 0x1d5   : > { %p1124_p6 = por %p1123_p3, %p1122_p1 }
 0x1d6   : > { %p1120_p9 = pneg %p1119_p2 }
 0x1d8   : > { %p1125_p11 = pnand %p1124_p6, %p1120_p9 }
 0x1da   : > { %1128 = shalt.err (!%p1125_p11)
}
 0x1db   : > { %s1179_s28 = smov 128   ;;  %s1180_s29 = smov 8  }
 0x1dc   : > { %1005 = dma.vmem_to_hbm [thread:$0]  (%p1943_p12), %s1836_s5, 2048, %s1834_s14, %s901_s10, %s1179_s28, %s1179_s28, %s1180_s29  }
 0x1dd PF: > { %s929_s2 = sand.u32 1, %s1155_s6   ;;  %p1944_p13 = scmp.ne.s32.totalorder %s1896_s19, 0 }
 0x1de   : > { %p1945_p4 = scmp.ge.s32.totalorder %s1167_s9, 2  ;;  %s930_s3 = scalar_lea.sflag [#allocation5], %s929_s2 }
 0x1e0   : > { %p1012_p5 = pnand %p1945_p4, %p1944_p13 }
 0x1e2   : > { %p1013_p7 = pneg %p1012_p5 }
 0x1e4   : > { %1150 = dma.done.wait (%p1013_p7), %s930_s3, 2048  }
 0x1e5   : > { %1152 = vsyncadd (%p1013_p7), %s930_s3, 4294965248  ;;  %p14_p8 = scmp.ge.s32.totalorder %s1216_s12, 4   ;;  %s1946_s6 = smov %s1159_s7 }
 0x1e6   : > { %s1947_s7 = smov %s1163_s8  ;;  %s1948_s8 = smov %s1228_s15 }
 0x1e7   : > { %s1949_s9 = smov %s1216_s12  ;;  %16 = sbr.rel (!%p14_p8) target bundleno = 5 (0x5), region = 69 }
 0x1ec   :  { %935 = vsyncpa [#allocation4], 1 }
 0x1ed   :  { %937 = vsyncpa [#allocation4 + $0x1], 1 }
 0x1ee   :  { %938 = vsyncpa [#allocation5], 1 }
 0x1ef   :  { %940 = vsyncpa [#allocation5 + $0x1], 1 }

</bundles_post_ra>
